<compile_context>
chip_gen: v7x
topology: tpu7x:2x2x1
jax: 0.10.0
libtpu: 0.0.40
codegen_flags: <defaults>
</compile_context>

<pallas_src>
import functools

import jax
import jax.numpy as jnp
from jax.experimental import pallas as pl
from jax.experimental.pallas import tpu as pltpu

NEG_SLOPE = 0.01  # torch.nn.LeakyReLU default negative_slope

N_VIEWS = 4
N_JOINTS = 8
BACKBONE_FEATURES = 32
BACKBONE_LAYERS = 2
MASTER_FEATURES = 32
R_LAYERS = 2
T_LAYERS = 2
SCALE_T = 0.1

IN_FEATURES = N_VIEWS * N_JOINTS * 2        # 64
R_OUT = 6 * N_VIEWS                         # 24
T_OUT = 3 * N_VIEWS                         # 12
HEAD_OUT = R_OUT + T_OUT                    # 36

LANE = 128                                  # lane-dense padded feature width
MAX_BATCH_TILE = 512                        # rows per grid step (VMEM budget)

assert R_LAYERS == T_LAYERS, "R/t head fusion assumes equal depth"


def _round_up(n, m):
    return ((n + m - 1) // m) * m


def _leaky_relu(x):
    return jnp.where(x >= 0, x, NEG_SLOPE * x)


# --------------------------------------------------------------------------
# Pallas kernel: fused MLP (backbone + fused R|t heads) on one batch tile
# --------------------------------------------------------------------------
def _rototrans_kernel(layer_kinds, x_ref, w_ref, b_ref, out_ref):
    """x_ref:   (TB, 128) padded input tile.
    w_ref:   (n_layers, 128, 128) zero-padded weight slab (VMEM-resident).
    b_ref:   (n_layers, 1, 128) zero-padded bias slab (VMEM-resident).
    out_ref: (TB, 128); cols [0:24]=R feats, [24:36]=t*scale_t, rest zero.
    """
    h = x_ref[...]
    for l, kind in enumerate(layer_kinds):            # static unroll (8 layers)
        y = jnp.dot(h, w_ref[l], preferred_element_type=jnp.float32) + b_ref[l]
        if kind == "act":                              # Linear + LeakyReLU
            h = _leaky_relu(y)
        elif kind == "res":                            # residual block
            h = h + _leaky_relu(y)
        else:                                          # plain Linear (tail)
            h = y
    out_ref[...] = h


# --------------------------------------------------------------------------
# Parameter init (PyTorch nn.Linear default init), weight layout (in, out)
# --------------------------------------------------------------------------
def _init_linear(key, in_f, out_f):
    kw, kb = jax.random.split(key)
    bound = 1.0 / jnp.sqrt(float(in_f))
    w = jax.random.uniform(kw, (in_f, out_f), jnp.float32, -bound, bound)
    b = jax.random.uniform(kb, (out_f,), jnp.float32, -bound, bound)
    return w, b


def init_mlp_resnet(key, in_f, inner, n_inner_layers, out_f):
    keys = jax.random.split(key, n_inner_layers + 2)
    params = []
    w, b = _init_linear(keys[0], in_f, inner)
    params += [w, b]
    for k in range(n_inner_layers):
        w, b = _init_linear(keys[1 + k], inner, inner)
        params += [w, b]
    w, b = _init_linear(keys[-1], inner, out_f)
    params += [w, b]
    return params


def init_rototransnet_params(key):
    k_bb, k_r, k_t = jax.random.split(key, 3)
    return {
        "backbone": init_mlp_resnet(k_bb, IN_FEATURES, BACKBONE_FEATURES,
                                    BACKBONE_LAYERS, MASTER_FEATURES),
        "R": init_mlp_resnet(k_r, MASTER_FEATURES, MASTER_FEATURES,
                             R_LAYERS, R_OUT),
        "t": init_mlp_resnet(k_t, MASTER_FEATURES, MASTER_FEATURES,
                             T_LAYERS, T_OUT),
    }


# --------------------------------------------------------------------------
# Weight packing: backbone layers + fused (R | t) head, zero-padded to 128
# --------------------------------------------------------------------------
def _block_diag(a, b):
    ra, ca = a.shape
    rb, cb = b.shape
    top = jnp.concatenate([a, jnp.zeros((ra, cb), a.dtype)], axis=1)
    bot = jnp.concatenate([jnp.zeros((rb, ca), b.dtype), b], axis=1)
    return jnp.concatenate([top, bot], axis=0)


def _pad2(a, rows, cols):
    return jnp.pad(a, ((0, rows - a.shape[0]), (0, cols - a.shape[1])))


def _pad1(a, n):
    return jnp.pad(a, (0, n - a.shape[0]))


def _pack_params(params):
    def pairs(p):
        return [(p[2 * i], p[2 * i + 1]) for i in range(len(p) // 2)]

    bb_p = pairs(params["backbone"])
    r_p = pairs(params["R"])
    t_p = pairs(params["t"])

    layers, kinds = [], []

    # --- backbone MLPResNet ---
    layers.append(bb_p[0]); kinds.append("act")
    for w, b in bb_p[1:-1]:
        layers.append((w, b)); kinds.append("res")
    layers.append(bb_p[-1]); kinds.append("lin")

    # --- fused R|t head ---
    (wr, br), (wt, bt) = r_p[0], t_p[0]
    layers.append((jnp.concatenate([wr, wt], axis=1),
                   jnp.concatenate([br, bt], axis=0)))
    kinds.append("act")
    for (wr, br), (wt, bt) in zip(r_p[1:-1], t_p[1:-1]):
        layers.append((_block_diag(wr, wt),
                       jnp.concatenate([br, bt], axis=0)))
        kinds.append("res")
    (wr, br), (wt, bt) = r_p[-1], t_p[-1]
    # fold scale_t into the t output columns / bias
    layers.append((_block_diag(wr, wt * SCALE_T),
                   jnp.concatenate([br, bt * SCALE_T], axis=0)))
    kinds.append("lin")

    w_slab = jnp.stack([_pad2(w, LANE, LANE) for w, _ in layers])       # (L,128,128)
    b_slab = jnp.stack([_pad1(b, LANE)[None, :] for _, b in layers])    # (L,1,128)
    return w_slab, b_slab, tuple(kinds)


# --------------------------------------------------------------------------
# Plain-JAX glue: 6D -> rotation matrix, RotoTrans assembly
# --------------------------------------------------------------------------
def _r6d_to_rotmat(r6):
    """R6DBlock (Zhou et al. ortho6d): basis vectors stacked as COLUMNS,
    matching compute_rotation_matrix_from_ortho6d in the reference code."""
    a1, a2 = r6[..., :3], r6[..., 3:]
    eps = 1e-8
    x = a1 / jnp.maximum(jnp.linalg.norm(a1, axis=-1, keepdims=True), eps)
    z = jnp.cross(x, a2)
    z = z / jnp.maximum(jnp.linalg.norm(z, axis=-1, keepdims=True), eps)
    y = jnp.cross(z, x)
    return jnp.stack([x, y, z], axis=-1)  # (..., 3, 3)


def _roto_trans_combine(rotations, translations):
    """RotoTransCombiner: [[R | t], [0 0 0 1]] per (batch, view)."""
    B, V = rotations.shape[:2]
    if translations.shape[-2] == 1:
        # DepthBlock-style depth-only t head (dead for this config).
        zeros = jnp.zeros((B, V, 2, 1), translations.dtype)
        trans = jnp.concatenate([zeros, translations], axis=-2)
    else:
        trans = translations
    roto_trans = jnp.concatenate([rotations, trans], axis=-1)          # (B,V,3,4)
    bottom = jnp.broadcast_to(
        jnp.array([0.0, 0.0, 0.0, 1.0], jnp.float32), (B, V, 1, 4))
    return jnp.concatenate([roto_trans, bottom], axis=-2)              # (B,V,4,4)


# --------------------------------------------------------------------------
# Forward
# --------------------------------------------------------------------------
def rototransnet_forward(x, params):
    B = x.shape[0]
    x_flat = x.reshape(B, -1).astype(jnp.float32)                      # nn.Flatten

    w_slab, b_slab, kinds = _pack_params(params)
    n_layers = w_slab.shape[0]

    # Batch tile: multiple of 8 (f32 sublane), capped for VMEM headroom.
    tb = min(MAX_BATCH_TILE, _round_up(B, 8))
    b_pad = _round_up(B, tb)

    # Pad batch rows and pad features to a lane-dense 128-wide slab.
    x_pad = jnp.pad(x_flat,
                    ((0, b_pad - B), (0, LANE - x_flat.shape[1])))

    kern = functools.partial(_rototrans_kernel, kinds)
    out = pl.pallas_call(
        kern,
        out_shape=jax.ShapeDtypeStruct((b_pad, LANE), jnp.float32),
        grid=(b_pad // tb,),
        in_specs=[
            # batch tile of padded inputs (pipelined across the grid)
            pl.BlockSpec((tb, LANE), lambda i: (i, 0)),
            # weight / bias slabs: same block every step => VMEM-resident
            pl.BlockSpec((n_layers, LANE, LANE), lambda i: (0, 0, 0)),
            pl.BlockSpec((n_layers, 1, LANE), lambda i: (0, 0, 0)),
        ],
        out_specs=pl.BlockSpec((tb, LANE), lambda i: (i, 0)),
        compiler_params=pltpu.CompilerParams(
            dimension_semantics=("parallel",)),
    )(x_pad, w_slab, b_slab)

    r_feats = out[:B, :R_OUT]                                          # (B, 24)
    t_scaled = out[:B, R_OUT:R_OUT + T_OUT]                            # (B, 12)

    # _forward_R: view(-1, n_views, 6) then per-view R6DBlock (vectorized)
    rotations = _r6d_to_rotmat(r_feats.reshape(B, N_VIEWS, 6))         # (B,V,3,3)
    # _forward_t: view(-1, n_views, 3) * scale_t (scale folded into kernel)
    translations = t_scaled.reshape(B, N_VIEWS, 3, 1)                  # (B,V,3,1)
    # TODO(synk): 'rod' (RodriguesBlock) parametrization and the DepthBlock
    # (look_at_pelvis) t-branch are not implemented; config uses '6d' + MLPResNet.
    return _roto_trans_combine(rotations, translations)                # (B,V,4,4)


if __name__ == "__main__":
    key = jax.random.PRNGKey(0)
    k_params, k_x = jax.random.split(key)

    params = init_rototransnet_params(k_params)
    # x ~ (batch_size, n_views, n_joints, 2D)
    x = jax.random.normal(k_x, (2, N_VIEWS, N_JOINTS, 2), jnp.float32)

    fwd = jax.jit(rototransnet_forward)
    out = fwd(x, params)
    out = jax.block_until_ready(out)

    assert out.shape == (2, N_VIEWS, 4, 4), out.shape
    assert out.dtype == jnp.float32
    print("KERNEL_OK")
</pallas_src>

<mosaic_0001>
module attributes {stable_mosaic.version = 11 : i64} {
  func.func @_rototrans_kernel(%arg0: i32, %arg1: memref<8x128xf32, #tpu.memory_space<vmem>>, %arg2: memref<8x128x128xf32, #tpu.memory_space<vmem>>, %arg3: memref<8x1x128xf32, #tpu.memory_space<vmem>>, %arg4: memref<8x128xf32, #tpu.memory_space<vmem>>) attributes {dimension_semantics = [#tpu.dimension_semantics<parallel>], iteration_bounds = array<i64: 1>, scalar_prefetch = 0 : i64, scratch_operands = 0 : i64, tpu.core_type = #tpu.core_type<tc>, window_params = [{transform_indices = @transform_0, window_bounds = array<i64: 8, 128>}, {pipeline_mode = #tpu.pipeline_mode<synchronous>, transform_indices = @transform_1, window_bounds = array<i64: 8, 128, 128>}, {pipeline_mode = #tpu.pipeline_mode<synchronous>, transform_indices = @transform_2, window_bounds = array<i64: 8, 1, 128>}, {transform_indices = @transform_3, window_bounds = array<i64: 8, 128>}]} {
    %c0 = arith.constant 0 : index
    %c0_0 = arith.constant 0 : index
    %0 = vector.load %arg1[%c0, %c0_0] : memref<8x128xf32, #tpu.memory_space<vmem>>, vector<8x128xf32>
    %c0_1 = arith.constant 0 : index
    %c0_2 = arith.constant 0 : index
    %c0_3 = arith.constant 0 : index
    %1 = vector.load %arg2[%c0_1, %c0_2, %c0_3] : memref<8x128x128xf32, #tpu.memory_space<vmem>>, vector<1x128x128xf32>
    %2 = vector.shape_cast %1 : vector<1x128x128xf32> to vector<128x128xf32>
    %cst = arith.constant dense<0.000000e+00> : vector<8x128xf32>
    %3 = tpu.matmul %0, %2, %cst {dimension_numbers = #tpu.dot_dimension_numbers<[1], [0], [0], [1], [0, 0, 1, 1], [], []>} : vector<8x128xf32>, vector<128x128xf32>, vector<8x128xf32> -> vector<8x128xf32>
    %c0_4 = arith.constant 0 : index
    %c0_5 = arith.constant 0 : index
    %c0_6 = arith.constant 0 : index
    %4 = vector.load %arg3[%c0_4, %c0_5, %c0_6] : memref<8x1x128xf32, #tpu.memory_space<vmem>>, vector<1x1x128xf32>
    %5 = vector.shape_cast %4 : vector<1x1x128xf32> to vector<1x128xf32>
    %6 = vector.broadcast %5 : vector<1x128xf32> to vector<8x128xf32>
    %7 = arith.addf %3, %6 : vector<8x128xf32>
    %cst_7 = arith.constant 0.000000e+00 : f32
    %8 = vector.broadcast %cst_7 : f32 to vector<8x128xf32>
    %9 = arith.cmpf oge, %7, %8 : vector<8x128xf32>
    %cst_8 = arith.constant 0.00999999977 : f32
    %10 = vector.broadcast %cst_8 : f32 to vector<8x128xf32>
    %11 = arith.mulf %10, %7 : vector<8x128xf32>
    %12 = arith.select %9, %7, %11 : vector<8x128xi1>, vector<8x128xf32>
    %c1 = arith.constant 1 : index
    %c0_9 = arith.constant 0 : index
    %c0_10 = arith.constant 0 : index
    %13 = vector.load %arg2[%c1, %c0_9, %c0_10] : memref<8x128x128xf32, #tpu.memory_space<vmem>>, vector<1x128x128xf32>
    %14 = vector.shape_cast %13 : vector<1x128x128xf32> to vector<128x128xf32>
    %cst_11 = arith.constant dense<0.000000e+00> : vector<8x128xf32>
    %15 = tpu.matmul %12, %14, %cst_11 {dimension_numbers = #tpu.dot_dimension_numbers<[1], [0], [0], [1], [0, 0, 1, 1], [], []>} : vector<8x128xf32>, vector<128x128xf32>, vector<8x128xf32> -> vector<8x128xf32>
    %c1_12 = arith.constant 1 : index
    %c0_13 = arith.constant 0 : index
    %c0_14 = arith.constant 0 : index
    %16 = vector.load %arg3[%c1_12, %c0_13, %c0_14] : memref<8x1x128xf32, #tpu.memory_space<vmem>>, vector<1x1x128xf32>
    %17 = vector.shape_cast %16 : vector<1x1x128xf32> to vector<1x128xf32>
    %18 = vector.broadcast %17 : vector<1x128xf32> to vector<8x128xf32>
    %19 = arith.addf %15, %18 : vector<8x128xf32>
    %cst_15 = arith.constant 0.000000e+00 : f32
    %20 = vector.broadcast %cst_15 : f32 to vector<8x128xf32>
    %21 = arith.cmpf oge, %19, %20 : vector<8x128xf32>
    %cst_16 = arith.constant 0.00999999977 : f32
    %22 = vector.broadcast %cst_16 : f32 to vector<8x128xf32>
    %23 = arith.mulf %22, %19 : vector<8x128xf32>
    %24 = arith.select %21, %19, %23 : vector<8x128xi1>, vector<8x128xf32>
    %25 = arith.addf %12, %24 : vector<8x128xf32>
    %c2 = arith.constant 2 : index
    %c0_17 = arith.constant 0 : index
    %c0_18 = arith.constant 0 : index
    %26 = vector.load %arg2[%c2, %c0_17, %c0_18] : memref<8x128x128xf32, #tpu.memory_space<vmem>>, vector<1x128x128xf32>
    %27 = vector.shape_cast %26 : vector<1x128x128xf32> to vector<128x128xf32>
    %cst_19 = arith.constant dense<0.000000e+00> : vector<8x128xf32>
    %28 = tpu.matmul %25, %27, %cst_19 {dimension_numbers = #tpu.dot_dimension_numbers<[1], [0], [0], [1], [0, 0, 1, 1], [], []>} : vector<8x128xf32>, vector<128x128xf32>, vector<8x128xf32> -> vector<8x128xf32>
    %c2_20 = arith.constant 2 : index
    %c0_21 = arith.constant 0 : index
    %c0_22 = arith.constant 0 : index
    %29 = vector.load %arg3[%c2_20, %c0_21, %c0_22] : memref<8x1x128xf32, #tpu.memory_space<vmem>>, vector<1x1x128xf32>
    %30 = vector.shape_cast %29 : vector<1x1x128xf32> to vector<1x128xf32>
    %31 = vector.broadcast %30 : vector<1x128xf32> to vector<8x128xf32>
    %32 = arith.addf %28, %31 : vector<8x128xf32>
    %cst_23 = arith.constant 0.000000e+00 : f32
    %33 = vector.broadcast %cst_23 : f32 to vector<8x128xf32>
    %34 = arith.cmpf oge, %32, %33 : vector<8x128xf32>
    %cst_24 = arith.constant 0.00999999977 : f32
    %35 = vector.broadcast %cst_24 : f32 to vector<8x128xf32>
    %36 = arith.mulf %35, %32 : vector<8x128xf32>
    %37 = arith.select %34, %32, %36 : vector<8x128xi1>, vector<8x128xf32>
    %38 = arith.addf %25, %37 : vector<8x128xf32>
    %c3 = arith.constant 3 : index
    %c0_25 = arith.constant 0 : index
    %c0_26 = arith.constant 0 : index
    %39 = vector.load %arg2[%c3, %c0_25, %c0_26] : memref<8x128x128xf32, #tpu.memory_space<vmem>>, vector<1x128x128xf32>
    %40 = vector.shape_cast %39 : vector<1x128x128xf32> to vector<128x128xf32>
    %cst_27 = arith.constant dense<0.000000e+00> : vector<8x128xf32>
    %41 = tpu.matmul %38, %40, %cst_27 {dimension_numbers = #tpu.dot_dimension_numbers<[1], [0], [0], [1], [0, 0, 1, 1], [], []>} : vector<8x128xf32>, vector<128x128xf32>, vector<8x128xf32> -> vector<8x128xf32>
    %c3_28 = arith.constant 3 : index
    %c0_29 = arith.constant 0 : index
    %c0_30 = arith.constant 0 : index
    %42 = vector.load %arg3[%c3_28, %c0_29, %c0_30] : memref<8x1x128xf32, #tpu.memory_space<vmem>>, vector<1x1x128xf32>
    %43 = vector.shape_cast %42 : vector<1x1x128xf32> to vector<1x128xf32>
    %44 = vector.broadcast %43 : vector<1x128xf32> to vector<8x128xf32>
    %45 = arith.addf %41, %44 : vector<8x128xf32>
    %c4 = arith.constant 4 : index
    %c0_31 = arith.constant 0 : index
    %c0_32 = arith.constant 0 : index
    %46 = vector.load %arg2[%c4, %c0_31, %c0_32] : memref<8x128x128xf32, #tpu.memory_space<vmem>>, vector<1x128x128xf32>
    %47 = vector.shape_cast %46 : vector<1x128x128xf32> to vector<128x128xf32>
    %cst_33 = arith.constant dense<0.000000e+00> : vector<8x128xf32>
    %48 = tpu.matmul %45, %47, %cst_33 {dimension_numbers = #tpu.dot_dimension_numbers<[1], [0], [0], [1], [0, 0, 1, 1], [], []>} : vector<8x128xf32>, vector<128x128xf32>, vector<8x128xf32> -> vector<8x128xf32>
    %c4_34 = arith.constant 4 : index
    %c0_35 = arith.constant 0 : index
    %c0_36 = arith.constant 0 : index
    %49 = vector.load %arg3[%c4_34, %c0_35, %c0_36] : memref<8x1x128xf32, #tpu.memory_space<vmem>>, vector<1x1x128xf32>
    %50 = vector.shape_cast %49 : vector<1x1x128xf32> to vector<1x128xf32>
    %51 = vector.broadcast %50 : vector<1x128xf32> to vector<8x128xf32>
    %52 = arith.addf %48, %51 : vector<8x128xf32>
    %cst_37 = arith.constant 0.000000e+00 : f32
    %53 = vector.broadcast %cst_37 : f32 to vector<8x128xf32>
    %54 = arith.cmpf oge, %52, %53 : vector<8x128xf32>
    %cst_38 = arith.constant 0.00999999977 : f32
    %55 = vector.broadcast %cst_38 : f32 to vector<8x128xf32>
    %56 = arith.mulf %55, %52 : vector<8x128xf32>
    %57 = arith.select %54, %52, %56 : vector<8x128xi1>, vector<8x128xf32>
    %c5 = arith.constant 5 : index
    %c0_39 = arith.constant 0 : index
    %c0_40 = arith.constant 0 : index
    %58 = vector.load %arg2[%c5, %c0_39, %c0_40] : memref<8x128x128xf32, #tpu.memory_space<vmem>>, vector<1x128x128xf32>
    %59 = vector.shape_cast %58 : vector<1x128x128xf32> to vector<128x128xf32>
    %cst_41 = arith.constant dense<0.000000e+00> : vector<8x128xf32>
    %60 = tpu.matmul %57, %59, %cst_41 {dimension_numbers = #tpu.dot_dimension_numbers<[1], [0], [0], [1], [0, 0, 1, 1], [], []>} : vector<8x128xf32>, vector<128x128xf32>, vector<8x128xf32> -> vector<8x128xf32>
    %c5_42 = arith.constant 5 : index
    %c0_43 = arith.constant 0 : index
    %c0_44 = arith.constant 0 : index
    %61 = vector.load %arg3[%c5_42, %c0_43, %c0_44] : memref<8x1x128xf32, #tpu.memory_space<vmem>>, vector<1x1x128xf32>
    %62 = vector.shape_cast %61 : vector<1x1x128xf32> to vector<1x128xf32>
    %63 = vector.broadcast %62 : vector<1x128xf32> to vector<8x128xf32>
    %64 = arith.addf %60, %63 : vector<8x128xf32>
    %cst_45 = arith.constant 0.000000e+00 : f32
    %65 = vector.broadcast %cst_45 : f32 to vector<8x128xf32>
    %66 = arith.cmpf oge, %64, %65 : vector<8x128xf32>
    %cst_46 = arith.constant 0.00999999977 : f32
    %67 = vector.broadcast %cst_46 : f32 to vector<8x128xf32>
    %68 = arith.mulf %67, %64 : vector<8x128xf32>
    %69 = arith.select %66, %64, %68 : vector<8x128xi1>, vector<8x128xf32>
    %70 = arith.addf %57, %69 : vector<8x128xf32>
    %c6 = arith.constant 6 : index
    %c0_47 = arith.constant 0 : index
    %c0_48 = arith.constant 0 : index
    %71 = vector.load %arg2[%c6, %c0_47, %c0_48] : memref<8x128x128xf32, #tpu.memory_space<vmem>>, vector<1x128x128xf32>
    %72 = vector.shape_cast %71 : vector<1x128x128xf32> to vector<128x128xf32>
    %cst_49 = arith.constant dense<0.000000e+00> : vector<8x128xf32>
    %73 = tpu.matmul %70, %72, %cst_49 {dimension_numbers = #tpu.dot_dimension_numbers<[1], [0], [0], [1], [0, 0, 1, 1], [], []>} : vector<8x128xf32>, vector<128x128xf32>, vector<8x128xf32> -> vector<8x128xf32>
    %c6_50 = arith.constant 6 : index
    %c0_51 = arith.constant 0 : index
    %c0_52 = arith.constant 0 : index
    %74 = vector.load %arg3[%c6_50, %c0_51, %c0_52] : memref<8x1x128xf32, #tpu.memory_space<vmem>>, vector<1x1x128xf32>
    %75 = vector.shape_cast %74 : vector<1x1x128xf32> to vector<1x128xf32>
    %76 = vector.broadcast %75 : vector<1x128xf32> to vector<8x128xf32>
    %77 = arith.addf %73, %76 : vector<8x128xf32>
    %cst_53 = arith.constant 0.000000e+00 : f32
    %78 = vector.broadcast %cst_53 : f32 to vector<8x128xf32>
    %79 = arith.cmpf oge, %77, %78 : vector<8x128xf32>
    %cst_54 = arith.constant 0.00999999977 : f32
    %80 = vector.broadcast %cst_54 : f32 to vector<8x128xf32>
    %81 = arith.mulf %80, %77 : vector<8x128xf32>
    %82 = arith.select %79, %77, %81 : vector<8x128xi1>, vector<8x128xf32>
    %83 = arith.addf %70, %82 : vector<8x128xf32>
    %c7 = arith.constant 7 : index
    %c0_55 = arith.constant 0 : index
    %c0_56 = arith.constant 0 : index
    %84 = vector.load %arg2[%c7, %c0_55, %c0_56] : memref<8x128x128xf32, #tpu.memory_space<vmem>>, vector<1x128x128xf32>
    %85 = vector.shape_cast %84 : vector<1x128x128xf32> to vector<128x128xf32>
    %cst_57 = arith.constant dense<0.000000e+00> : vector<8x128xf32>
    %86 = tpu.matmul %83, %85, %cst_57 {dimension_numbers = #tpu.dot_dimension_numbers<[1], [0], [0], [1], [0, 0, 1, 1], [], []>} : vector<8x128xf32>, vector<128x128xf32>, vector<8x128xf32> -> vector<8x128xf32>
    %c7_58 = arith.constant 7 : index
    %c0_59 = arith.constant 0 : index
    %c0_60 = arith.constant 0 : index
    %87 = vector.load %arg3[%c7_58, %c0_59, %c0_60] : memref<8x1x128xf32, #tpu.memory_space<vmem>>, vector<1x1x128xf32>
    %88 = vector.shape_cast %87 : vector<1x1x128xf32> to vector<1x128xf32>
    %89 = vector.broadcast %88 : vector<1x128xf32> to vector<8x128xf32>
    %90 = arith.addf %86, %89 : vector<8x128xf32>
    %c0_61 = arith.constant 0 : index
    %c0_62 = arith.constant 0 : index
    %91 = vector.load %arg4[%c0_61, %c0_62] : memref<8x128xf32, #tpu.memory_space<vmem>>, vector<8x128xf32>
    tpu.vector_store %arg4[%c0_61, %c0_62], %90 {strides = array<i32>} : memref<8x128xf32, #tpu.memory_space<vmem>>, vector<8x128xf32>,
    return
  }
  func.func @transform_0(%arg0: i32) -> (i32, i32) {
    %c0_i32 = arith.constant 0 : i32
    %c0_i32_0 = arith.constant 0 : i32
    return %arg0, %c0_i32 : i32, i32
  }
  func.func @transform_1(%arg0: i32) -> (i32, i32, i32) {
    %c0_i32 = arith.constant 0 : i32
    %c0_i32_0 = arith.constant 0 : i32
    %c0_i32_1 = arith.constant 0 : i32
    %c0_i32_2 = arith.constant 0 : i32
    return %c0_i32, %c0_i32_0, %c0_i32_1 : i32, i32, i32
  }
  func.func @transform_2(%arg0: i32) -> (i32, i32, i32) {
    %c0_i32 = arith.constant 0 : i32
    %c0_i32_0 = arith.constant 0 : i32
    %c0_i32_1 = arith.constant 0 : i32
    %c0_i32_2 = arith.constant 0 : i32
    return %c0_i32, %c0_i32_0, %c0_i32_1 : i32, i32, i32
  }
  func.func @transform_3(%arg0: i32) -> (i32, i32) {
    %c0_i32 = arith.constant 0 : i32
    %c0_i32_0 = arith.constant 0 : i32
    return %arg0, %c0_i32 : i32, i32
  }
}

</mosaic_0001>

<bundles_post_ra>
// kernel: rototransnet_forward.1
= control target key start
LH: loop header
LB: loop body
LE: loop exit
PB: predicated region body
PF: predicated region fallthrough
CT: control target
= control target key end

     0   :  { %v1538_v0 = vmov 0.0|0.0   ;;  %vm1539_vm0 = vmmov 0   ;;  %v1540_v4 = vmov 0.0   ;;  %s2055_s1 = inlined_call_operand.vmem [shape: f32[8,128,128], index: 1, kind: input, shape index: {}]   ;;  %s2056_s0 = inlined_call_operand.vmem [shape: f32[8,128], index: 0, kind: input, shape index: {}]   ;;  %s2057_s2 = inlined_call_operand.vmem [shape: f32[8,1,128], index: 2, kind: input, shape index: {}]   ;;  %s2058_s3 = inlined_call_operand.vmem [shape: f32[8,128], index: 3, kind: output, shape index: {}]  }
   0x1   :  { %1343 = vmatprep.subr.bf16.mxu0 %v1538_v0  ;;  %v15_v1 = vld [vmem:[%s2055_s1] sm:$0xff]  ;;  %v16_v2 = vld [vmem:[%s2055_s1 + $0x8] sm:$0xff]  ;;  %v17_v3 = vld [vmem:[%s2055_s1 + $0x10] sm:$0xff]  ;;  %1095 = vmatprep.mubr.msk.f32.mxu0 %vm1539_vm0, %v1540_v4 }
   0x2   :  { %v1344_v5 = vpack.c.bf16 %v16_v2, %v15_v1  ;;  %v18_v6 = vld [vmem:[%s2055_s1 + $0x18] sm:$0xff]  ;;  %1367 = vmatprep.subr.bf16.mxu1 %v1538_v0  ;;  %1130 = vmatprep.mubr.msk.f32.mxu1 %vm1539_vm0, %v1540_v4  ;;  %v19_v8 = vld [vmem:[%s2055_s1 + $0x20] sm:$0xff]  ;;  %v20_v9 = vld [vmem:[%s2055_s1 + $0x28] sm:$0xff] }
   0x3   :  { %v1347_v7 = vpack.c.bf16 %v18_v6, %v17_v3  ;;  %v801_v10 = vld [vmem:[%s2055_s1 + $0x80] sm:$0xff]  ;;  %v802_v11 = vld [vmem:[%s2055_s1 + $0x88] sm:$0xff]  ;;  %v803_v12 = vld [vmem:[%s2055_s1 + $0x90] sm:$0xff]  ;;  %v1350_v14 = vpack.c.bf16 %v20_v9, %v19_v8 }
   0x4   :  { %1345 = vmatpush3.bf16.msra.mxu0 %v1344_v5  ;;  %v804_v13 = vld [vmem:[%s2055_s1 + $0x98] sm:$0xff]  ;;  %v1368_v15 = vpack.c.bf16 %v802_v11, %v801_v10  ;;  %v21_v16 = vld [vmem:[%s2055_s1 + $0x30] sm:$0xff]  ;;  %v805_v19 = vld [vmem:[%s2055_s1 + $0xa0] sm:$0xff] }
   0x5   :  { %1346 = vmatprep.subr.bf16.mxu0 %v1538_v0  ;;  %v22_v17 = vld [vmem:[%s2055_s1 + $0x38] sm:$0xff]  ;;  %v1371_v18 = vpack.c.bf16 %v804_v13, %v803_v12  ;;  %v806_v20 = vld [vmem:[%s2055_s1 + $0xa8] sm:$0xff]  ;;  %v23_v22 = vld [vmem:[%s2055_s1 + $0x40] sm:$0xff] }
   0x6   :  { %1369 = vmatpush3.bf16.msra.mxu1 %v1368_v15  ;;  %v1353_v21 = vpack.c.bf16 %v22_v17, %v21_v16  ;;  %v24_v23 = vld [vmem:[%s2055_s1 + $0x48] sm:$0xff]  ;;  %v1374_v24 = vpack.c.bf16 %v806_v20, %v805_v19  ;;  %v807_v25 = vld [vmem:[%s2055_s1 + $0xb0] sm:$0xff]  ;;  %v808_v26 = vld [vmem:[%s2055_s1 + $0xb8] sm:$0xff] }
   0x7   :  { %1370 = vmatprep.subr.bf16.mxu1 %v1538_v0  ;;  %v1356_v27 = vpack.c.bf16 %v24_v23, %v23_v22  ;;  %v25_v28 = vld [vmem:[%s2055_s1 + $0x50] sm:$0xff]  ;;  %v26_v29 = vld [vmem:[%s2055_s1 + $0x58] sm:$0xff]  ;;  %v1377_v30 = vpack.c.bf16 %v808_v26, %v807_v25  ;;  %v809_v31 = vld [vmem:[%s2055_s1 + $0xc0] sm:$0xff] }
   0x8   :  { %1348 = vmatpush3.bf16.msra.mxu0 %v1347_v7  ;;  %v810_v32 = vld [vmem:[%s2055_s1 + $0xc8] sm:$0xff]  ;;  %v1359_v33 = vpack.c.bf16 %v26_v29, %v25_v28  ;;  %v27_v34 = vld [vmem:[%s2055_s1 + $0x60] sm:$0xff]  ;;  %v811_v37 = vld [vmem:[%s2055_s1 + $0xd0] sm:$0xff] }
   0x9   :  { %1349 = vmatprep.subr.bf16.mxu0 %v1538_v0  ;;  %v28_v35 = vld [vmem:[%s2055_s1 + $0x68] sm:$0xff]  ;;  %v1380_v36 = vpack.c.bf16 %v810_v32, %v809_v31  ;;  %v812_v38 = vld [vmem:[%s2055_s1 + $0xd8] sm:$0xff]  ;;  %v29_v40 = vld [vmem:[%s2055_s1 + $0x70] sm:$0xff] }
   0xa   :  { %1372 = vmatpush3.bf16.msra.mxu1 %v1371_v18  ;;  %v1362_v39 = vpack.c.bf16 %v28_v35, %v27_v34  ;;  %v30_v41 = vld [vmem:[%s2055_s1 + $0x78] sm:$0xff]  ;;  %v1383_v42 = vpack.c.bf16 %v812_v38, %v811_v37  ;;  %v813_v43 = vld [vmem:[%s2055_s1 + $0xe0] sm:$0xff]  ;;  %v814_v44 = vld [vmem:[%s2055_s1 + $0xe8] sm:$0xff] }
   0xb   :  { %1373 = vmatprep.subr.bf16.mxu1 %v1538_v0  ;;  %v1365_v45 = vpack.c.bf16 %v30_v41, %v29_v40  ;;  %v1386_v46 = vpack.c.bf16 %v814_v44, %v813_v43  ;;  %v14_v47 = vld [vmem:[%s2056_s0] sm:$0xff]  ;;  %v815_v48 = vld [vmem:[%s2055_s1 + $0xf0] sm:$0xff]  ;;  %v816_v49 = vld [vmem:[%s2055_s1 + $0xf8] sm:$0xff] }
   0xc   :  { %1351 = vmatpush3.bf16.msra.mxu0 %v1350_v14  ;;  %v1389_v50 = vpack.c.bf16 %v816_v49, %v815_v48  ;;  %v819_v51 = vld [vmem:[%s2055_s1 + $0x100] sm:$0xff]  ;;  %v820_v52 = vld [vmem:[%s2055_s1 + $0x108] sm:$0xff]  ;;  %v821_v53 = vld [vmem:[%s2055_s1 + $0x110] sm:$0xff] }
   0xd   :  { %1352 = vmatprep.subr.bf16.mxu0 %v1538_v0  ;;  %v1392_v54 = vpack.c.bf16 %v820_v52, %v819_v51  ;;  %v822_v55 = vld [vmem:[%s2055_s1 + $0x118] sm:$0xff]  ;;  %v823_v57 = vld [vmem:[%s2055_s1 + $0x120] sm:$0xff]  ;;  %v824_v58 = vld [vmem:[%s2055_s1 + $0x128] sm:$0xff] }
   0xe   :  { %1375 = vmatpush3.bf16.msra.mxu1 %v1374_v24  ;;  %v1395_v56 = vpack.c.bf16 %v822_v55, %v821_v53  ;;  %v1398_v59 = vpack.c.bf16 %v824_v58, %v823_v57  ;;  %v825_v60 = vld [vmem:[%s2055_s1 + $0x130] sm:$0xff]  ;;  %v826_v61 = vld [vmem:[%s2055_s1 + $0x138] sm:$0xff]  ;;  %v827_v63 = vld [vmem:[%s2055_s1 + $0x140] sm:$0xff] }
   0xf   :  { %1376 = vmatprep.subr.bf16.mxu1 %v1538_v0  ;;  %v1401_v62 = vpack.c.bf16 %v826_v61, %v825_v60  ;;  %v828_v1 = vld [vmem:[%s2055_s1 + $0x148] sm:$0xff]  ;;  %v829_v3 = vld [vmem:[%s2055_s1 + $0x150] sm:$0xff]  ;;  %v830_v5 = vld [vmem:[%s2055_s1 + $0x158] sm:$0xff] }
  0x10   :  { %1354 = vmatpush3.bf16.msra.mxu0 %v1353_v21  ;;  %v1404_v2 = vpack.c.bf16 %v828_v1, %v827_v63  ;;  %v1407_v6 = vpack.c.bf16 %v830_v5, %v829_v3  ;;  %v800_v7 = vld [vmem:[%s2057_s2] ss:$0 sm:$0xff]  ;;  %v832_v14 = vld [vmem:[%s2055_s1 + $0x168] sm:$0xff]  ;;  %v833_v16 = vld [vmem:[%s2055_s1 + $0x170] sm:$0xff] }
  0x11   :  { %1355 = vmatprep.subr.bf16.mxu0 %v1538_v0  ;;  %v831_v13 = vld [vmem:[%s2055_s1 + $0x160] sm:$0xff]  ;;  %v834_v17 = vld [vmem:[%s2055_s1 + $0x178] sm:$0xff]  ;;  %v838_v20 = vld [vmem:[%s2055_s1 + $0x188] sm:$0xff] }
  0x12   :  { %1378 = vmatpush3.bf16.msra.mxu1 %v1377_v30  ;;  %v1410_v15 = vpack.c.bf16 %v832_v14, %v831_v13  ;;  %v1413_v18 = vpack.c.bf16 %v834_v17, %v833_v16  ;;  %v837_v19 = vld [vmem:[%s2055_s1 + $0x180] sm:$0xff]  ;;  %v839_v21 = vld [vmem:[%s2055_s1 + $0x190] sm:$0xff]  ;;  %v840_v23 = vld [vmem:[%s2055_s1 + $0x198] sm:$0xff] }
  0x13   :  { %1379 = vmatprep.subr.bf16.mxu1 %v1538_v0  ;;  %v1416_v22 = vpack.c.bf16 %v838_v20, %v837_v19  ;;  %v1419_v24 = vpack.c.bf16 %v840_v23, %v839_v21  ;;  %v841_v25 = vld [vmem:[%s2055_s1 + $0x1a0] sm:$0xff]  ;;  %v842_v26 = vld [vmem:[%s2055_s1 + $0x1a8] sm:$0xff]  ;;  %v843_v28 = vld [vmem:[%s2055_s1 + $0x1b0] sm:$0xff] }
  0x14   :  { %1357 = vmatpush3.bf16.msra.mxu0 %v1356_v27  ;;  %v1422_v27 = vpack.c.bf16 %v842_v26, %v841_v25  ;;  %v844_v29 = vld [vmem:[%s2055_s1 + $0x1b8] sm:$0xff]  ;;  %v845_v31 = vld [vmem:[%s2055_s1 + $0x1c0] sm:$0xff]  ;;  %v846_v32 = vld [vmem:[%s2055_s1 + $0x1c8] sm:$0xff] }
  0x15   :  { %1358 = vmatprep.subr.bf16.mxu0 %v1538_v0  ;;  %v1425_v30 = vpack.c.bf16 %v844_v29, %v843_v28  ;;  %v847_v34 = vld [vmem:[%s2055_s1 + $0x1d0] sm:$0xff]  ;;  %v848_v35 = vld [vmem:[%s2055_s1 + $0x1d8] sm:$0xff]  ;;  %v818_v37 = vld [vmem:[%s2057_s2 + $0x1] ss:$0 sm:$0xff] }
  0x16   :  { %1381 = vmatpush3.bf16.msra.mxu1 %v1380_v36  ;;  %v1431_v36 = vpack.c.bf16 %v848_v35, %v847_v34  ;;  %v849_v44 = vld [vmem:[%s2055_s1 + $0x1e0] sm:$0xff]  ;;  %v852_v48 = vld [vmem:[%s2055_s1 + $0x1f8] sm:$0xff]  ;;  %v856_v51 = vld [vmem:[%s2055_s1 + $0x208] sm:$0xff] }
  0x17   :  { %1382 = vmatprep.subr.bf16.mxu1 %v1538_v0  ;;  %v857_v52 = vld [vmem:[%s2055_s1 + $0x210] sm:$0xff]  ;;  %v860_v57 = vld [vmem:[%s2055_s1 + $0x228] sm:$0xff]  ;;  %v862_v60 = vld [vmem:[%s2055_s1 + $0x238] sm:$0xff] }
  0x18   :  { %1360 = vmatpush3.bf16.msra.mxu0 %v1359_v33  ;;  %v1428_v33 = vpack.c.bf16 %v846_v32, %v845_v31  ;;  %v864_v63 = vld [vmem:[%s2055_s1 + $0x248] sm:$0xff]  ;;  %v866_v3 = vld [vmem:[%s2055_s1 + $0x258] sm:$0xff]  ;;  %v869_v16 = vld [vmem:[%s2055_s1 + $0x270] sm:$0xff] }
  0x19   :  { %1361 = vmatprep.subr.bf16.mxu0 %v1538_v0  ;;  %v870_v17 = vld [vmem:[%s2055_s1 + $0x278] sm:$0xff]  ;;  %v873_v19 = vld [vmem:[%s2055_s1 + $0x280] sm:$0xff]  ;;  %v874_v20 = vld [vmem:[%s2055_s1 + $0x288] sm:$0xff] }
  0x1a   :  { %1384 = vmatpush3.bf16.msra.mxu1 %v1383_v42  ;;  %v875_v21 = vld [vmem:[%s2055_s1 + $0x290] sm:$0xff]  ;;  %v876_v23 = vld [vmem:[%s2055_s1 + $0x298] sm:$0xff]  ;;  %v877_v25 = vld [vmem:[%s2055_s1 + $0x2a0] sm:$0xff] }
  0x1b   :  { %1385 = vmatprep.subr.bf16.mxu1 %v1538_v0  ;;  %v878_v26 = vld [vmem:[%s2055_s1 + $0x2a8] sm:$0xff]  ;;  %v879_v28 = vld [vmem:[%s2055_s1 + $0x2b0] sm:$0xff]  ;;  %v880_v29 = vld [vmem:[%s2055_s1 + $0x2b8] sm:$0xff] }
  0x1c   :  { %1363 = vmatpush3.bf16.msra.mxu0 %v1362_v39  ;;  %v881_v31 = vld [vmem:[%s2055_s1 + $0x2c0] sm:$0xff]  ;;  %v882_v32 = vld [vmem:[%s2055_s1 + $0x2c8] sm:$0xff]  ;;  %v883_v34 = vld [vmem:[%s2055_s1 + $0x2d0] sm:$0xff] }
  0x1d   :  { %1364 = vmatprep.subr.bf16.mxu0 %v1538_v0  ;;  %v884_v35 = vld [vmem:[%s2055_s1 + $0x2d8] sm:$0xff] }
  0x1e   :  { %1387 = vmatpush3.bf16.msra.mxu1 %v1386_v46 }
  0x1f   :  { %1388 = vmatprep.subr.bf16.mxu1 %v1538_v0 }
  0x20   :  { %1366 = vmatpush3.bf16.msra.mxu0 %v1365_v45  ;;  %v850_v45 = vld [vmem:[%s2055_s1 + $0x1e8] sm:$0xff] }
  0x21   :  { %1391 = vmatprep.subr.bf16.mxu0 %v1538_v0  ;;  %v1434_v46 = vpack.c.bf16 %v850_v45, %v849_v44  ;;  %v887_v44 = vld [vmem:[%s2055_s1 + $0x2f0] sm:$0xff]  ;;  %v888_v45 = vld [vmem:[%s2055_s1 + $0x2f8] sm:$0xff] }
  0x22   :  { %1390 = vmatpush3.bf16.msra.mxu1 %v1389_v50  ;;  %v855_v50 = vld [vmem:[%s2055_s1 + $0x200] sm:$0xff] }
  0x23   :  { %1096 = vmatmul.mubr.f32.vlgmr.msra.gmra.mrb[0].mxu0 %v14_v47  ;;  %1415 = vmatprep.subr.bf16.mxu1 %v1538_v0  ;;  %v851_v47 = vld [vmem:[%s2055_s1 + $0x1f0] sm:$0xff]  ;;  %v1440_v53 = vpack.c.bf16 %v856_v51, %v855_v50  ;;  %v894_v51 = vld [vmem:[%s2055_s1 + $0x318] sm:$0xff] }
  0x24   :  { %1165 = vmatprep.mubr.msk.f32.mxu0 %vm1539_vm0, %v1540_v4  ;;  %1393 = vmatpush3.bf16.msra.mxu0 %v1392_v54  ;;  %v1437_v49 = vpack.c.bf16 %v852_v48, %v851_v47  ;;  %v858_v54 = vld [vmem:[%s2055_s1 + $0x218] sm:$0xff]  ;;  %v891_v47 = vld [vmem:[%s2055_s1 + $0x300] sm:$0xff]  ;;  %v892_v48 = vld [vmem:[%s2055_s1 + $0x308] sm:$0xff] }
  0x25   :  { %1394 = vmatprep.subr.bf16.mxu0 %v1538_v0  ;;  %v1443_v55 = vpack.c.bf16 %v858_v54, %v857_v52  ;;  %v1488_v50 = vpack.c.bf16 %v892_v48, %v891_v47  ;;  %v896_v54 = vld [vmem:[%s2055_s1 + $0x328] sm:$0xff] }
  0x28   :  { %1396 = vmatpush3.bf16.msra.mxu0 %v1395_v56  ;;  %v859_v56 = vld [vmem:[%s2055_s1 + $0x220] sm:$0xff] }
  0x29   :  { %1397 = vmatprep.subr.bf16.mxu0 %v1538_v0  ;;  %v1446_v58 = vpack.c.bf16 %v860_v57, %v859_v56  ;;  %v897_v56 = vld [vmem:[%s2055_s1 + $0x330] sm:$0xff]  ;;  %v898_v57 = vld [vmem:[%s2055_s1 + $0x338] sm:$0xff] }
  0x2c   :  { %1399 = vmatpush3.bf16.msra.mxu0 %v1398_v59  ;;  %v861_v59 = vld [vmem:[%s2055_s1 + $0x230] sm:$0xff] }
  0x2d   :  { %1400 = vmatprep.subr.bf16.mxu0 %v1538_v0  ;;  %v1449_v61 = vpack.c.bf16 %v862_v60, %v861_v59  ;;  %v899_v59 = vld [vmem:[%s2055_s1 + $0x340] sm:$0xff]  ;;  %v900_v60 = vld [vmem:[%s2055_s1 + $0x348] sm:$0xff] }
  0x30   :  { %1402 = vmatpush3.bf16.msra.mxu0 %v1401_v62  ;;  %v863_v62 = vld [vmem:[%s2055_s1 + $0x240] sm:$0xff] }
  0x31   :  { %1403 = vmatprep.subr.bf16.mxu0 %v1538_v0  ;;  %v1452_v1 = vpack.c.bf16 %v864_v63, %v863_v62  ;;  %v901_v62 = vld [vmem:[%s2055_s1 + $0x350] sm:$0xff]  ;;  %v902_v63 = vld [vmem:[%s2055_s1 + $0x358] sm:$0xff] }
  0x34   :  { %1405 = vmatpush3.bf16.msra.mxu0 %v1404_v2  ;;  %v865_v2 = vld [vmem:[%s2055_s1 + $0x250] sm:$0xff] }
  0x35   :  { %1406 = vmatprep.subr.bf16.mxu0 %v1538_v0  ;;  %v1455_v5 = vpack.c.bf16 %v866_v3, %v865_v2  ;;  %v872_v2 = vld [vmem:[%s2057_s2 + $0x4] ss:$0 sm:$0xff] }
  0x38   :  { %1408 = vmatpush3.bf16.msra.mxu0 %v1407_v6  ;;  %v867_v6 = vld [vmem:[%s2055_s1 + $0x260] sm:$0xff] }
  0x39   :  { %1409 = vmatprep.subr.bf16.mxu0 %v1538_v0 }
  0x3c   :  { %1411 = vmatpush3.bf16.msra.mxu0 %v1410_v15 }
  0x3d   :  { %1412 = vmatprep.subr.bf16.mxu0 %v1538_v0 }
  0x40   :  { %1414 = vmatpush3.bf16.msra.mxu0 %v1413_v18  ;;  %v1461_v18 = vpack.c.bf16 %v870_v17, %v869_v16  ;;  %v911_v16 = vld [vmem:[%s2055_s1 + $0x390] sm:$0xff] }
  0x41   :  { %1439 = vmatprep.subr.bf16.mxu0 %v1538_v0 }
  0xf6   :  { %v104_v8 = vpop.f32.mrb[0].mxu0 }
  0xf7   :  { %v105_v9 = vadd.f32 %v800_v7, %v104_v8  ;;  %v1097_v10 = vpop.f32.mrb[1].mxu0  ;;  %v868_v7 = vld [vmem:[%s2055_s1 + $0x268] sm:$0xff] }
  0xf8   :  { %v1458_v8 = vpack.c.bf16 %v868_v7, %v867_v6 }
  0xf9   :  { %v109_v11 = vmul.f32 0.01, %v105_v9  ;;  %vm108_vm1 = vcmp.ge.f32.partialorder %v105_v9, 0.0 }
  0xfb   :  { %v110_v12 = vsel %vm108_vm1, %v105_v9, %v109_v11  ;;  %v836_v9 = vld [vmem:[%s2057_s2 + $0x2] ss:$0 sm:$0xff] }
  0xfc   :  { %1131 = vmatmul.mubr.f32.vlgmr.msra.gmra.mrb[0].mxu1 %v110_v12 }
  0xfd   :  { %1200 = vmatprep.mubr.msk.f32.mxu1 %vm1539_vm0, %v1540_v4  ;;  %1417 = vmatpush3.bf16.msra.mxu1 %v1416_v22  ;;  %v1464_v22 = vpack.c.bf16 %v874_v20, %v873_v19  ;;  %v913_v20 = vld [vmem:[%s2055_s1 + $0x3a0] sm:$0xff] }
  0xfe   :  { %1418 = vmatprep.subr.bf16.mxu1 %v1538_v0 }
 0x101   :  { %1420 = vmatpush3.bf16.msra.mxu1 %v1419_v24  ;;  %v1467_v24 = vpack.c.bf16 %v876_v23, %v875_v21  ;;  %v914_v21 = vld [vmem:[%s2055_s1 + $0x3a8] sm:$0xff]  ;;  %v915_v23 = vld [vmem:[%s2055_s1 + $0x3b0] sm:$0xff] }
 0x102   :  { %1421 = vmatprep.subr.bf16.mxu1 %v1538_v0 }
 0x105   :  { %1423 = vmatpush3.bf16.msra.mxu1 %v1422_v27  ;;  %v1470_v27 = vpack.c.bf16 %v878_v26, %v877_v25  ;;  %v917_v26 = vld [vmem:[%s2055_s1 + $0x3c0] sm:$0xff] }
 0x106   :  { %1424 = vmatprep.subr.bf16.mxu1 %v1538_v0 }
 0x109   :  { %1426 = vmatpush3.bf16.msra.mxu1 %v1425_v30  ;;  %v1473_v30 = vpack.c.bf16 %v880_v29, %v879_v28  ;;  %v919_v29 = vld [vmem:[%s2055_s1 + $0x3d0] sm:$0xff] }
 0x10a   :  { %1427 = vmatprep.subr.bf16.mxu1 %v1538_v0 }
 0x10d   :  { %1429 = vmatpush3.bf16.msra.mxu1 %v1428_v33  ;;  %v1476_v33 = vpack.c.bf16 %v882_v32, %v881_v31  ;;  %v890_v32 = vld [vmem:[%s2057_s2 + $0x5] ss:$0 sm:$0xff] }
 0x10e   :  { %1430 = vmatprep.subr.bf16.mxu1 %v1538_v0 }
 0x111   :  { %1432 = vmatpush3.bf16.msra.mxu1 %v1431_v36  ;;  %v1479_v36 = vpack.c.bf16 %v884_v35, %v883_v34 }
 0x112   :  { %1433 = vmatprep.subr.bf16.mxu1 %v1538_v0 }
 0x115   :  { %1435 = vmatpush3.bf16.msra.mxu1 %v1434_v46  ;;  %v1485_v46 = vpack.c.bf16 %v888_v45, %v887_v44  ;;  %v908_v45 = vld [vmem:[%s2057_s2 + $0x6] ss:$0 sm:$0xff] }
 0x116   :  { %1436 = vmatprep.subr.bf16.mxu1 %v1538_v0 }
 0x119   :  { %1438 = vmatpush3.bf16.msra.mxu1 %v1437_v49  ;;  %v893_v49 = vld [vmem:[%s2055_s1 + $0x310] sm:$0xff] }
 0x11a   :  { %1463 = vmatprep.subr.bf16.mxu1 %v1538_v0  ;;  %v1491_v52 = vpack.c.bf16 %v894_v51, %v893_v49  ;;  %v926_v51 = vld [vmem:[%s2057_s2 + $0x7] ss:$0 sm:$0xff] }
 0x1cf   :  { %v202_v38 = vpop.f32.mrb[0].mxu1 }
 0x1d0   :  { %v203_v39 = vadd.f32 %v818_v37, %v202_v38  ;;  %v1132_v40 = vpop.f32.mrb[1].mxu1  ;;  %v885_v37 = vld [vmem:[%s2055_s1 + $0x2e0] sm:$0xff]  ;;  %v886_v38 = vld [vmem:[%s2055_s1 + $0x2e8] sm:$0xff] }
 0x1d1   :  { %v854_v40 = vld [vmem:[%s2057_s2 + $0x3] ss:$0 sm:$0xff] }
 0x1d2   :  { %vm206_vm2 = vcmp.ge.f32.partialorder %v203_v39, 0.0  ;;  %v207_v41 = vmul.f32 0.01, %v203_v39 }
 0x1d4   :  { %v208_v42 = vsel %vm206_vm2, %v203_v39, %v207_v41  ;;  %v1482_v39 = vpack.c.bf16 %v886_v38, %v885_v37 }
 0x1d5   :  { %v209_v43 = vadd.f32 %v208_v42, %v110_v12 }
 0x1d7   :  { %1166 = vmatmul.mubr.f32.vlgmr.msra.gmra.mrb[2].mxu0 %v209_v43 }
 0x1d8   :  { %1235 = vmatprep.mubr.msk.f32.mxu0 %vm1539_vm0, %v1540_v4  ;;  %1441 = vmatpush3.bf16.msra.mxu0 %v1440_v53  ;;  %v895_v53 = vld [vmem:[%s2055_s1 + $0x320] sm:$0xff] }
 0x1d9   :  { %1442 = vmatprep.subr.bf16.mxu0 %v1538_v0 }
 0x1dc   :  { %1444 = vmatpush3.bf16.msra.mxu0 %v1443_v55  ;;  %v1494_v55 = vpack.c.bf16 %v896_v54, %v895_v53 }
 0x1dd   :  { %1445 = vmatprep.subr.bf16.mxu0 %v1538_v0 }
 0x1e0   :  { %1447 = vmatpush3.bf16.msra.mxu0 %v1446_v58  ;;  %v1497_v58 = vpack.c.bf16 %v898_v57, %v897_v56 }
 0x1e1   :  { %1448 = vmatprep.subr.bf16.mxu0 %v1538_v0 }
 0x1e4   :  { %1450 = vmatpush3.bf16.msra.mxu0 %v1449_v61  ;;  %v1500_v61 = vpack.c.bf16 %v900_v60, %v899_v59 }
 0x1e5   :  { %1451 = vmatprep.subr.bf16.mxu0 %v1538_v0 }
 0x1e8   :  { %1453 = vmatpush3.bf16.msra.mxu0 %v1452_v1  ;;  %v1503_v1 = vpack.c.bf16 %v902_v63, %v901_v62 }
 0x1e9   :  { %1454 = vmatprep.subr.bf16.mxu0 %v1538_v0 }
 0x1ec   :  { %1456 = vmatpush3.bf16.msra.mxu0 %v1455_v5 }
 0x1ed   :  { %1457 = vmatprep.subr.bf16.mxu0 %v1538_v0 }
 0x1f0   :  { %1459 = vmatpush3.bf16.msra.mxu0 %v1458_v8 }
 0x1f1   :  { %1460 = vmatprep.subr.bf16.mxu0 %v1538_v0 }
 0x1f4   :  { %1462 = vmatpush3.bf16.msra.mxu0 %v1461_v18  ;;  %v912_v18 = vld [vmem:[%s2055_s1 + $0x398] sm:$0xff] }
 0x1f5   :  { %1487 = vmatprep.subr.bf16.mxu0 %v1538_v0  ;;  %v1515_v19 = vpack.c.bf16 %v912_v18, %v911_v16 }
 0x2aa   :  { %v301_v10 = vpop.f32.mrb[2].mxu0 }
 0x2ab   :  { %v302_v11 = vadd.f32 %v836_v9, %v301_v10  ;;  %v1167_v12 = vpop.f32.mrb[3].mxu0  ;;  %v903_v9 = vld [vmem:[%s2055_s1 + $0x360] sm:$0xff]  ;;  %v904_v10 = vld [vmem:[%s2055_s1 + $0x368] sm:$0xff] }
 0x2ac   :  { %v905_v12 = vld [vmem:[%s2055_s1 + $0x370] sm:$0xff] }
 0x2ad   :  { %vm305_vm3 = vcmp.ge.f32.partialorder %v302_v11, 0.0  ;;  %v306_v13 = vmul.f32 0.01, %v302_v11 }
 0x2af   :  { %v307_v14 = vsel %vm305_vm3, %v302_v11, %v306_v13  ;;  %v1506_v11 = vpack.c.bf16 %v904_v10, %v903_v9 }
 0x2b0   :  { %v308_v15 = vadd.f32 %v307_v14, %v209_v43  ;;  %v909_v14 = vld [vmem:[%s2055_s1 + $0x380] sm:$0xff] }
 0x2b2   :  { %1201 = vmatmul.mubr.f32.vlgmr.msra.gmra.mrb[2].mxu1 %v308_v15  ;;  %v910_v15 = vld [vmem:[%s2055_s1 + $0x388] sm:$0xff] }
 0x2b3   :  { %1270 = vmatprep.mubr.msk.f32.mxu1 %vm1539_vm0, %v1540_v4  ;;  %1465 = vmatpush3.bf16.msra.mxu1 %v1464_v22  ;;  %v1512_v17 = vpack.c.bf16 %v910_v15, %v909_v14  ;;  %v1518_v22 = vpack.c.bf16 %v914_v21, %v913_v20 }
 0x2b4   :  { %1466 = vmatprep.subr.bf16.mxu1 %v1538_v0 }
 0x2b7   :  { %1468 = vmatpush3.bf16.msra.mxu1 %v1467_v24  ;;  %v916_v24 = vld [vmem:[%s2055_s1 + $0x3b8] sm:$0xff] }
 0x2b8   :  { %1469 = vmatprep.subr.bf16.mxu1 %v1538_v0  ;;  %v1521_v25 = vpack.c.bf16 %v916_v24, %v915_v23 }
 0x2bb   :  { %1471 = vmatpush3.bf16.msra.mxu1 %v1470_v27  ;;  %v918_v27 = vld [vmem:[%s2055_s1 + $0x3c8] sm:$0xff] }
 0x2bc   :  { %1472 = vmatprep.subr.bf16.mxu1 %v1538_v0  ;;  %v1524_v28 = vpack.c.bf16 %v918_v27, %v917_v26 }
 0x2bf   :  { %1474 = vmatpush3.bf16.msra.mxu1 %v1473_v30  ;;  %v920_v30 = vld [vmem:[%s2055_s1 + $0x3d8] sm:$0xff] }
 0x2c0   :  { %1475 = vmatprep.subr.bf16.mxu1 %v1538_v0  ;;  %v1527_v31 = vpack.c.bf16 %v920_v30, %v919_v29 }
 0x2c3   :  { %1477 = vmatpush3.bf16.msra.mxu1 %v1476_v33 }
 0x2c4   :  { %1478 = vmatprep.subr.bf16.mxu1 %v1538_v0 }
 0x2c7   :  { %1480 = vmatpush3.bf16.msra.mxu1 %v1479_v36 }
 0x2c8   :  { %1481 = vmatprep.subr.bf16.mxu1 %v1538_v0 }
 0x2cb   :  { %1483 = vmatpush3.bf16.msra.mxu1 %v1482_v39  ;;  %v921_v39 = vld [vmem:[%s2055_s1 + $0x3e0] sm:$0xff] }
 0x2cc   :  { %1484 = vmatprep.subr.bf16.mxu1 %v1538_v0 }
 0x2cf   :  { %1486 = vmatpush3.bf16.msra.mxu1 %v1485_v46 }
 0x2d0   :  { %1511 = vmatprep.subr.bf16.mxu1 %v1538_v0 }
 0x385   :  { %v400_v41 = vpop.f32.mrb[2].mxu1 }
 0x386   :  { %v401_v42 = vadd.f32 %v854_v40, %v400_v41  ;;  %v1202_v43 = vpop.f32.mrb[3].mxu1  ;;  %v922_v40 = vld [vmem:[%s2055_s1 + $0x3e8] sm:$0xff] }
 0x387   :  { %v1530_v41 = vpack.c.bf16 %v922_v40, %v921_v39  ;;  %v924_v43 = vld [vmem:[%s2055_s1 + $0x3f8] sm:$0xff] }
 0x388   :  { %1236 = vmatmul.mubr.f32.vlgmr.msra.gmra.mrb[4].mxu0 %v401_v42  ;;  %v923_v42 = vld [vmem:[%s2055_s1 + $0x3f0] sm:$0xff] }
 0x389   :  { %1305 = vmatprep.mubr.msk.f32.mxu0 %vm1539_vm0, %v1540_v4  ;;  %1489 = vmatpush3.bf16.msra.mxu0 %v1488_v50  ;;  %v1533_v44 = vpack.c.bf16 %v924_v43, %v923_v42 }
 0x38a   :  { %1490 = vmatprep.subr.bf16.mxu0 %v1538_v0 }
 0x38d   :  { %1492 = vmatpush3.bf16.msra.mxu0 %v1491_v52 }
 0x38e   :  { %1493 = vmatprep.subr.bf16.mxu0 %v1538_v0 }
 0x391   :  { %1495 = vmatpush3.bf16.msra.mxu0 %v1494_v55 }
 0x392   :  { %1496 = vmatprep.subr.bf16.mxu0 %v1538_v0 }
 0x395   :  { %1498 = vmatpush3.bf16.msra.mxu0 %v1497_v58 }
 0x396   :  { %1499 = vmatprep.subr.bf16.mxu0 %v1538_v0 }
 0x399   :  { %1501 = vmatpush3.bf16.msra.mxu0 %v1500_v61 }
 0x39a   :  { %1502 = vmatprep.subr.bf16.mxu0 %v1538_v0 }
 0x39d   :  { %1504 = vmatpush3.bf16.msra.mxu0 %v1503_v1 }
 0x39e   :  { %1505 = vmatprep.subr.bf16.mxu0 %v1538_v0 }
 0x3a1   :  { %1507 = vmatpush3.bf16.msra.mxu0 %v1506_v11 }
 0x3a2   :  { %1508 = vmatprep.subr.bf16.mxu0 %v1538_v0 }
 0x45b   :  { %v495_v3 = vpop.f32.mrb[4].mxu0 }
 0x45c   :  { %v496_v5 = vadd.f32 %v872_v2, %v495_v3  ;;  %v1237_v6 = vpop.f32.mrb[5].mxu0 }
 0x45e   :  { %vm499_vm4 = vcmp.ge.f32.partialorder %v496_v5, 0.0  ;;  %v500_v7 = vmul.f32 0.01, %v496_v5 }
 0x460   :  { %v501_v8 = vsel %vm499_vm4, %v496_v5, %v500_v7 }
 0x461   :  { %1271 = vmatmul.mubr.f32.vlgmr.msra.gmra.mrb[4].mxu1 %v501_v8 }
 0x462   :  { %1340 = vmatprep.mubr.msk.f32.mxu1 %vm1539_vm0, %v1540_v4  ;;  %v906_v4 = vld [vmem:[%s2055_s1 + $0x378] sm:$0xff]  ;;  %1513 = vmatpush3.bf16.msra.mxu1 %v1512_v17 }
 0x463   :  { %v1509_v13 = vpack.c.bf16 %v906_v4, %v905_v12  ;;  %1514 = vmatprep.subr.bf16.mxu1 %v1538_v0 }
 0x465   :  { %1510 = vmatpush3.bf16.msra.mxu0 %v1509_v13 }
 0x466   :  { %1516 = vmatpush3.bf16.msra.mxu1 %v1515_v19 }
 0x467   :  { %1517 = vmatprep.subr.bf16.mxu1 %v1538_v0 }
 0x46a   :  { %1519 = vmatpush3.bf16.msra.mxu1 %v1518_v22 }
 0x46b   :  { %1520 = vmatprep.subr.bf16.mxu1 %v1538_v0 }
 0x46e   :  { %1522 = vmatpush3.bf16.msra.mxu1 %v1521_v25 }
 0x46f   :  { %1523 = vmatprep.subr.bf16.mxu1 %v1538_v0 }
 0x472   :  { %1525 = vmatpush3.bf16.msra.mxu1 %v1524_v28 }
 0x473   :  { %1526 = vmatprep.subr.bf16.mxu1 %v1538_v0 }
 0x476   :  { %1528 = vmatpush3.bf16.msra.mxu1 %v1527_v31 }
 0x477   :  { %1529 = vmatprep.subr.bf16.mxu1 %v1538_v0 }
 0x47a   :  { %1531 = vmatpush3.bf16.msra.mxu1 %v1530_v41 }
 0x47b   :  { %1532 = vmatprep.subr.bf16.mxu1 %v1538_v0 }
 0x47e   :  { %1534 = vmatpush3.bf16.msra.mxu1 %v1533_v44 }
 0x534   :  { %v593_v33 = vpop.f32.mrb[4].mxu1 }
 0x535   :  { %v594_v34 = vadd.f32 %v890_v32, %v593_v33  ;;  %v1272_v35 = vpop.f32.mrb[5].mxu1 }
 0x537   :  { %vm597_vm5 = vcmp.ge.f32.partialorder %v594_v34, 0.0  ;;  %v598_v36 = vmul.f32 0.01, %v594_v34 }
 0x539   :  { %v599_v37 = vsel %vm597_vm5, %v594_v34, %v598_v36 }
 0x53a   :  { %v600_v38 = vadd.f32 %v599_v37, %v501_v8 }
 0x53c   :  { %1306 = vmatmul.mubr.f32.vlgmr.msra.gmra.mrb[6].mxu0 %v600_v38 }
 0x60f   :  { %v692_v46 = vpop.f32.mrb[6].mxu0 }
 0x610   :  { %v693_v47 = vadd.f32 %v908_v45, %v692_v46  ;;  %v1307_v48 = vpop.f32.mrb[7].mxu0 }
 0x612   :  { %vm696_vm6 = vcmp.ge.f32.partialorder %v693_v47, 0.0  ;;  %v697_v49 = vmul.f32 0.01, %v693_v47 }
 0x614   :  { %v698_v0 = vsel %vm696_vm6, %v693_v47, %v697_v49 }
 0x615   :  { %v699_v50 = vadd.f32 %v698_v0, %v600_v38 }
 0x617   :  { %1341 = vmatmul.mubr.f32.vlgmr.msra.gmra.mrb[6].mxu1 %v699_v50 }
 0x6ea   :  { %v791_v52 = vpop.f32.mrb[6].mxu1 }
 0x6eb   :  { %v792_v53 = vadd.f32 %v926_v51, %v791_v52  ;;  %v1342_v54 = vpop.f32.mrb[7].mxu1 }
 0x6ed   :  { %795 = vst [vmem:[%s2058_s3] sm:$0xff] %v792_v53 }

</bundles_post_ra>
